<compile_context>
chip_gen: v7x
topology: tpu7x:2x2x1
jax: 0.10.0
libtpu: 0.0.40
codegen_flags: <defaults>
</compile_context>

<pallas_src>
import functools

import numpy as np

import jax
import jax.numpy as jnp
from jax.experimental import pallas as pl
from jax.experimental.pallas import tpu as pltpu


# ----------------------------------------------------------------------------
# Static relative-coordinate tables and the phi / theta bias (wrapper-side).
# ----------------------------------------------------------------------------
def _relative_coords(window_size):
    Wh, Ww = window_size
    coords = np.stack(np.meshgrid(np.arange(Wh), np.arange(Ww), indexing="ij"))
    coords_flatten = coords.reshape(2, -1)                         # (2, N)
    rel = coords_flatten[:, :, None] - coords_flatten[:, None, :]  # (2, N, N)
    rel = rel.transpose(1, 2, 0)                                   # (N, N, 2)
    radius = rel[:, :, 0]     # in [-(Wh-1), Wh-1]
    azimuth = rel[:, :, 1]    # in [-(Ww-1), Ww-1]
    return radius, azimuth


def _phi_bias(azimuth, a_p, b_p, w_res):
    # torch negative table indexing wraps once -> emulate with a static mod.
    idx = np.mod(azimuth, a_p.shape[0])
    ap = a_p[idx]                                   # (N, N, nH)
    bp = b_p[idx]
    az = jnp.asarray(azimuth, jnp.float32) * (2.0 * np.pi / float(w_res))
    az = az[:, :, None]
    return ap * jnp.cos(az) + bp * jnp.sin(az)      # (N, N, nH)


def _theta_bias(radius, theta_max, a_r, b_r, h_res, window_size):
    idx = np.mod(radius, a_r.shape[0])
    ar = a_r[idx]                                   # (N, N, nH)
    br = b_r[idx]
    n_tokens = window_size[0] * window_size[1]
    time_t = n_tokens // theta_max.shape[0]
    tm = jnp.repeat(jnp.ravel(theta_max), time_t, axis=0)          # (N,)
    rad = jnp.asarray(radius, jnp.float32) * tm / float(h_res)     # (N, N)
    rad = rad[:, :, None]
    return ar * jnp.cos(rad) + br * jnp.sin(rad)    # (N, N, nH)


# ----------------------------------------------------------------------------
# Fused attention kernel: one grid step = `tb` windows.
# ----------------------------------------------------------------------------
def _window_attention_kernel(x_ref, wqkv_ref, bqkv_ref, bias_ref, wp_ref, bp_ref,
                             o_ref, *, n_tokens, n_channels):
    rows = x_ref.shape[0]
    tb = rows // n_tokens
    c = n_channels
    cd = x_ref.dtype                               # MXU compute dtype (bf16 / native)

    # ---- Fused QKV projection: one (rows, C) x (C, 3C) matmul, f32 accumulation.
    # qk scale is pre-folded into the first C columns of wqkv / bqkv.
    x = x_ref[...]
    qkv = jnp.dot(x, wqkv_ref[...], preferred_element_type=jnp.float32)
    qkv = qkv + bqkv_ref[...]                      # (1, 3C) f32 bias broadcast
    qkv = qkv.astype(cd)                           # single downcast for the MXU stages
    q = qkv[:, :c].reshape(tb, n_tokens, c)
    k = qkv[:, c:2 * c].reshape(tb, n_tokens, c)
    v = qkv[:, 2 * c:].reshape(tb, n_tokens, c)

    # ---- Scores + shared polar position bias, stable exp (all f32).
    attn = jnp.einsum("bnd,bmd->bnm", q, k, preferred_element_type=jnp.float32)
    attn = attn + bias_ref[...][None, :, :]
    attn = attn - jnp.max(attn, axis=-1, keepdims=True)
    p = jnp.exp(attn)
    denom = jnp.sum(p, axis=-1, keepdims=True)     # (tb, N, 1)

    # ---- Deferred softmax normalization: PV with unnormalized p, then one
    #      reciprocal-scale on the (tb, N, C) output (EUP, nearly free).
    out = jnp.einsum("bnm,bmd->bnd", p.astype(cd), v,
                     preferred_element_type=jnp.float32)
    out = out * pl.reciprocal(denom, approx=True)

    # ---- Output projection.
    out = out.reshape(rows, c).astype(cd)
    y = jnp.dot(out, wp_ref[...], preferred_element_type=jnp.float32) + bp_ref[...]
    # TODO(synk): on v5e, if the single vector-store slot saturates, pack four
    #             C=32 row-groups into one 128-lane slab before this store.
    o_ref[...] = y.astype(o_ref.dtype)


# ----------------------------------------------------------------------------
# Tiling helpers
# ----------------------------------------------------------------------------
def _vmem_limit_bytes():
    try:
        cap = int(pltpu.get_tpu_info().vmem_capacity_bytes)
    except Exception:
        cap = 64 * 1024 * 1024          # conservative default (v7x per-TC VMEM)
    # Leave headroom under the physical capacity; never exceed 96 MiB even on
    # 128 MiB parts (v5e / v6e), never go below the 32 MiB scoped default.
    return int(max(32 * 1024 * 1024, min(cap - (16 << 20), 96 * 1024 * 1024)))


def _pick_block_windows(B_, N, C, itemsize, vmem_limit):
    """Pick windows-per-grid-step: VMEM-budgeted, >= min(B_,4) steps, prefer tb | B_."""
    # Per-step live set is roughly: x slab + qkv(f32, 3x) + attn/p (f32, ~2N/C x)
    # + out, plus double-buffered in/out blocks -> keep the slab << vmem_limit.
    target = max(512 * 1024, min(4 * 1024 * 1024, vmem_limit // 24))
    by_vmem = max(1, target // (N * C * itemsize))
    min_blocks = min(B_, 4)             # megacore sharding + pipeline overlap
    by_grid = max(1, B_ // min_blocks)
    cap = int(max(1, min(B_, by_vmem, by_grid)))
    # Prefer a divisor of B_ (no tail padding, no extra HBM copy of x) that is
    # at least half the cap and keeps the block sublane-aligned.
    for tb in range(cap, 0, -1):
        if B_ % tb == 0 and (tb * N) % 8 == 0 and tb * 2 > cap:
            return tb
    return cap


# ----------------------------------------------------------------------------
# Wrapper
# ----------------------------------------------------------------------------
def window_attention(x, theta_max, params, *, window_size, input_resolution,
                     qk_scale=None, block_windows=None,
                     compute_dtype=jnp.bfloat16):
    """x: (B_, N, C) with N = Wh*Ww.  Single-head (num_heads = 1), mask=None path."""
    B_, N, C = x.shape
    assert N == window_size[0] * window_size[1]
    assert N % theta_max.shape[0] == 0
    scale = float(qk_scale if qk_scale is not None else C ** (-0.5))  # head_dim = C

    # Shared (N, N) polar relative-position bias (nH = 1 -> squeeze heads), f32.
    radius, azimuth = _relative_coords(window_size)
    a_phi = _phi_bias(azimuth, params["a_p"], params["b_p"], input_resolution[1])
    a_theta = _theta_bias(radius, theta_max, params["a_r"], params["b_r"],
                          input_resolution[0], window_size)
    bias = (a_phi + a_theta)[:, :, 0].astype(jnp.float32)             # (N, N)

    # Fused QKV weight; fold the qk scale into its first C columns at trace time.
    w_qkv = params["w_qkv"].astype(jnp.float32)                       # (C, 3C)
    b_qkv = params["b_qkv"].astype(jnp.float32)                       # (3C,)
    col_scale = jnp.concatenate(
        [jnp.full((C,), scale, jnp.float32), jnp.ones((2 * C,), jnp.float32)])
    w_qkv = (w_qkv * col_scale[None, :]).astype(compute_dtype)        # MXU dtype
    b_qkv = (b_qkv * col_scale).reshape(1, 3 * C)                     # f32
    w_proj = params["w_proj"].astype(compute_dtype)                   # (C, C)
    b_proj = params["b_proj"].astype(jnp.float32).reshape(1, C)

    vmem_limit = _vmem_limit_bytes()
    if block_windows is None:
        block_windows = _pick_block_windows(
            B_, N, C, jnp.dtype(compute_dtype).itemsize, vmem_limit)
    tb = int(block_windows)
    num_blocks = -(-B_ // tb)
    b_padded = num_blocks * tb

    x2 = x.reshape(B_ * N, C).astype(compute_dtype)
    if b_padded != B_:
        # Fallback only; _pick_block_windows prefers tb | B_ so this copy is avoided.
        x2 = jnp.pad(x2, ((0, (b_padded - B_) * N), (0, 0)))

    rows_per_block = tb * N
    kernel = functools.partial(_window_attention_kernel,
                               n_tokens=N, n_channels=C)

    out2 = pl.pallas_call(
        kernel,
        out_shape=jax.ShapeDtypeStruct((b_padded * N, C), x.dtype),
        grid_spec=pltpu.PrefetchScalarGridSpec(
            num_scalar_prefetch=0,
            grid=(num_blocks,),
            in_specs=[
                pl.BlockSpec((rows_per_block, C), lambda i: (i, 0)),   # x slab
                pl.BlockSpec((C, 3 * C), lambda i: (0, 0)),            # W_qkv (scaled)
                pl.BlockSpec((1, 3 * C), lambda i: (0, 0)),            # b_qkv (scaled)
                pl.BlockSpec((N, N), lambda i: (0, 0)),                # position bias
                pl.BlockSpec((C, C), lambda i: (0, 0)),                # W_proj
                pl.BlockSpec((1, C), lambda i: (0, 0)),                # b_proj
            ],
            out_specs=pl.BlockSpec((rows_per_block, C), lambda i: (i, 0)),
        ),
        compiler_params=pltpu.CompilerParams(
            dimension_semantics=("parallel",),
            vmem_limit_bytes=vmem_limit,
        ),
    )(x2, w_qkv, b_qkv, bias, w_proj, b_proj)

    return out2[:B_ * N].reshape(B_, N, C)


# ----------------------------------------------------------------------------
# Self-test
# ----------------------------------------------------------------------------
if __name__ == "__main__":
    key = jax.random.PRNGKey(0)
    keys = jax.random.split(key, 10)

    window_size = (8, 8)          # Wh, Ww -> N = 64
    input_resolution = (16, 16)   # H, W
    dim = 32
    N = window_size[0] * window_size[1]
    num_windows = (input_resolution[0] // window_size[0]) * \
                  (input_resolution[1] // window_size[1])
    batch = 2
    B_ = num_windows * batch      # 8

    x = jax.random.normal(keys[0], (B_, N, dim), jnp.float32)
    theta_max = jax.random.uniform(keys[1], (8,), jnp.float32, 0.5, 1.5)  # time_t = 8

    params = {
        "a_p": 0.02 * jax.random.normal(keys[2], (2 * window_size[1] - 1, 1), jnp.float32),
        "b_p": 0.02 * jax.random.normal(keys[3], (2 * window_size[1] - 1, 1), jnp.float32),
        "a_r": 0.02 * jax.random.normal(keys[4], (2 * window_size[0] - 1, 1), jnp.float32),
        "b_r": 0.02 * jax.random.normal(keys[5], (2 * window_size[0] - 1, 1), jnp.float32),
        "w_qkv": 0.1 * jax.random.normal(keys[6], (dim, 3 * dim), jnp.float32),
        "b_qkv": 0.1 * jax.random.normal(keys[7], (3 * dim,), jnp.float32),
        "w_proj": 0.1 * jax.random.normal(keys[8], (dim, dim), jnp.float32),
        "b_proj": 0.1 * jax.random.normal(keys[9], (dim,), jnp.float32),
    }

    out = jax.block_until_ready(window_attention(
        x, theta_max, params,
        window_size=window_size, input_resolution=input_resolution))

    # Pure-JAX reference mirroring the PyTorch forward (mask=None, eval mode).
    with jax.default_matmul_precision("highest"):
        scale = dim ** (-0.5)
        radius, azimuth = _relative_coords(window_size)
        a_phi = _phi_bias(azimuth, params["a_p"], params["b_p"], input_resolution[1])
        a_theta = _theta_bias(radius, theta_max, params["a_r"], params["b_r"],
                              input_resolution[0], window_size)
        bias = (a_phi + a_theta)[:, :, 0]

        wq, wk, wv = (params["w_qkv"][:, :dim],
                      params["w_qkv"][:, dim:2 * dim],
                      params["w_qkv"][:, 2 * dim:])
        bq, bk, bv = (params["b_qkv"][:dim],
                      params["b_qkv"][dim:2 * dim],
                      params["b_qkv"][2 * dim:])
        q = (x @ wq + bq) * scale
        k = x @ wk + bk
        v = x @ wv + bv
        attn = jnp.einsum("bnd,bmd->bnm", q, k) + bias[None]
        attn = jax.nn.softmax(attn, axis=-1)
        ref = jnp.einsum("bnm,bmd->bnd", attn, v) @ params["w_proj"] + params["b_proj"]

    assert out.shape == x.shape
    max_err = float(jnp.max(jnp.abs(out - ref)))
    assert jnp.allclose(out, ref, atol=2e-2, rtol=2e-2), f"mismatch vs reference: {max_err}"

    print("KERNEL_OK")
</pallas_src>

<mosaic_0001>
module attributes {stable_mosaic.version = 11 : i64} {
  func.func @_window_attention_kernel(%arg0: i32, %arg1: memref<128x32xbf16, #tpu.memory_space<vmem>>, %arg2: memref<32x96xbf16, #tpu.memory_space<vmem>>, %arg3: memref<1x96xf32, #tpu.memory_space<vmem>>, %arg4: memref<64x64xf32, #tpu.memory_space<vmem>>, %arg5: memref<32x32xbf16, #tpu.memory_space<vmem>>, %arg6: memref<1x32xf32, #tpu.memory_space<vmem>>, %arg7: memref<128x32xf32, #tpu.memory_space<vmem>>) attributes {dimension_semantics = [#tpu.dimension_semantics<parallel>], iteration_bounds = array<i64: 4>, scalar_prefetch = 0 : i64, scratch_operands = 0 : i64, tpu.core_type = #tpu.core_type<tc>, window_params = [{transform_indices = @transform_0, window_bounds = array<i64: 128, 32>}, {pipeline_mode = #tpu.pipeline_mode<synchronous>, transform_indices = @transform_1, window_bounds = array<i64: 32, 96>}, {pipeline_mode = #tpu.pipeline_mode<synchronous>, transform_indices = @transform_2, window_bounds = array<i64: 1, 96>}, {pipeline_mode = #tpu.pipeline_mode<synchronous>, transform_indices = @transform_3, window_bounds = array<i64: 64, 64>}, {pipeline_mode = #tpu.pipeline_mode<synchronous>, transform_indices = @transform_4, window_bounds = array<i64: 32, 32>}, {pipeline_mode = #tpu.pipeline_mode<synchronous>, transform_indices = @transform_5, window_bounds = array<i64: 1, 32>}, {transform_indices = @transform_6, window_bounds = array<i64: 128, 32>}]} {
    %c0 = arith.constant 0 : index
    %c0_0 = arith.constant 0 : index
    %0 = vector.load %arg1[%c0, %c0_0] : memref<128x32xbf16, #tpu.memory_space<vmem>>, vector<128x32xbf16>
    %c0_1 = arith.constant 0 : index
    %c0_2 = arith.constant 0 : index
    %1 = vector.load %arg2[%c0_1, %c0_2] : memref<32x96xbf16, #tpu.memory_space<vmem>>, vector<32x96xbf16>
    %cst = arith.constant dense<0.000000e+00> : vector<128x96xf32>
    %2 = tpu.matmul %0, %1, %cst {dimension_numbers = #tpu.dot_dimension_numbers<[1], [0], [0], [1], [0, 0, 1, 1], [], []>} : vector<128x32xbf16>, vector<32x96xbf16>, vector<128x96xf32> -> vector<128x96xf32>
    %c0_3 = arith.constant 0 : index
    %c0_4 = arith.constant 0 : index
    %3 = vector.load %arg3[%c0_3, %c0_4] : memref<1x96xf32, #tpu.memory_space<vmem>>, vector<1x96xf32>
    %4 = vector.broadcast %3 : vector<1x96xf32> to vector<128x96xf32>
    %5 = arith.addf %2, %4 : vector<128x96xf32>
    %6 = arith.truncf %5 : vector<128x96xf32> to vector<128x96xbf16>
    %7 = vector.extract_strided_slice %6 {offsets = [0, 0], sizes = [128, 32], strides = [1, 1]} : vector<128x96xbf16> to vector<128x32xbf16>
    %8 = vector.shape_cast %7 : vector<128x32xbf16> to vector<2x64x32xbf16>
    %9 = vector.extract_strided_slice %6 {offsets = [0, 32], sizes = [128, 32], strides = [1, 1]} : vector<128x96xbf16> to vector<128x32xbf16>
    %10 = vector.shape_cast %9 : vector<128x32xbf16> to vector<2x64x32xbf16>
    %11 = vector.extract_strided_slice %6 {offsets = [0, 64], sizes = [128, 32], strides = [1, 1]} : vector<128x96xbf16> to vector<128x32xbf16>
    %12 = vector.shape_cast %11 : vector<128x32xbf16> to vector<2x64x32xbf16>
    "tpu.trace_start"() <{level = 10 : i32, message = "bnd,bmd->bnm"}> : () -> ()
    %cst_5 = arith.constant dense<0.000000e+00> : vector<2x64x64xf32>
    %13 = tpu.matmul %8, %10, %cst_5 {dimension_numbers = #tpu.dot_dimension_numbers<[2], [2], [1], [1], [0, 0, 0, 1, 1, 1], [0], [0]>} : vector<2x64x32xbf16>, vector<2x64x32xbf16>, vector<2x64x64xf32> -> vector<2x64x64xf32>
    "tpu.trace_stop"() : () -> ()
    %c0_6 = arith.constant 0 : index
    %c0_7 = arith.constant 0 : index
    %14 = vector.load %arg4[%c0_6, %c0_7] : memref<64x64xf32, #tpu.memory_space<vmem>>, vector<64x64xf32>
    %15 = vector.shape_cast %14 : vector<64x64xf32> to vector<1x64x64xf32>
    %16 = vector.broadcast %15 : vector<1x64x64xf32> to vector<2x64x64xf32>
    %17 = arith.addf %13, %16 : vector<2x64x64xf32>
    %cst_8 = arith.constant dense<0xFF800000> : vector<2x64xf32>
    %18 = vector.multi_reduction <maximumf>, %17, %cst_8 [2] : vector<2x64x64xf32> to vector<2x64xf32>
    %19 = vector.shape_cast %18 : vector<2x64xf32> to vector<2x64x1xf32>
    %20 = vector.broadcast %19 : vector<2x64x1xf32> to vector<2x64x64xf32>
    %21 = arith.subf %17, %20 : vector<2x64x64xf32>
    %22 = math.exp %21 : vector<2x64x64xf32>
    %cst_9 = arith.constant dense<0.000000e+00> : vector<2x64xf32>
    %23 = vector.multi_reduction <add>, %22, %cst_9 [2] : vector<2x64x64xf32> to vector<2x64xf32>
    %24 = vector.shape_cast %23 : vector<2x64xf32> to vector<2x64x1xf32>
    %25 = arith.truncf %22 : vector<2x64x64xf32> to vector<2x64x64xbf16>
    "tpu.trace_start"() <{level = 10 : i32, message = "bnm,bmd->bnd"}> : () -> ()
    %cst_10 = arith.constant dense<0.000000e+00> : vector<2x64x32xf32>
    %26 = tpu.matmul %25, %12, %cst_10 {dimension_numbers = #tpu.dot_dimension_numbers<[2], [1], [1], [2], [0, 0, 0, 1, 1, 2], [0], [0]>} : vector<2x64x64xbf16>, vector<2x64x32xbf16>, vector<2x64x32xf32> -> vector<2x64x32xf32>
    "tpu.trace_stop"() : () -> ()
    %27 = tpu.reciprocal %24 {approx = true} : vector<2x64x1xf32> -> vector<2x64x1xf32>
    %28 = vector.broadcast %27 : vector<2x64x1xf32> to vector<2x64x32xf32>
    %29 = arith.mulf %26, %28 : vector<2x64x32xf32>
    %30 = vector.shape_cast %29 : vector<2x64x32xf32> to vector<128x32xf32>
    %31 = arith.truncf %30 : vector<128x32xf32> to vector<128x32xbf16>
    %c0_11 = arith.constant 0 : index
    %c0_12 = arith.constant 0 : index
    %32 = vector.load %arg5[%c0_11, %c0_12] : memref<32x32xbf16, #tpu.memory_space<vmem>>, vector<32x32xbf16>
    %cst_13 = arith.constant dense<0.000000e+00> : vector<128x32xf32>
    %33 = tpu.matmul %31, %32, %cst_13 {dimension_numbers = #tpu.dot_dimension_numbers<[1], [0], [0], [1], [0, 0, 1, 1], [], []>} : vector<128x32xbf16>, vector<32x32xbf16>, vector<128x32xf32> -> vector<128x32xf32>
    %c0_14 = arith.constant 0 : index
    %c0_15 = arith.constant 0 : index
    %34 = vector.load %arg6[%c0_14, %c0_15] : memref<1x32xf32, #tpu.memory_space<vmem>>, vector<1x32xf32>
    %35 = vector.broadcast %34 : vector<1x32xf32> to vector<128x32xf32>
    %36 = arith.addf %33, %35 : vector<128x32xf32>
    %c0_16 = arith.constant 0 : index
    %c0_17 = arith.constant 0 : index
    %37 = vector.load %arg7[%c0_16, %c0_17] : memref<128x32xf32, #tpu.memory_space<vmem>>, vector<128x32xf32>
    tpu.vector_store %arg7[%c0_16, %c0_17], %36 {strides = array<i32>} : memref<128x32xf32, #tpu.memory_space<vmem>>, vector<128x32xf32>,
    return
  }
  func.func @transform_0(%arg0: i32) -> (i32, i32) {
    %c0_i32 = arith.constant 0 : i32
    %c0_i32_0 = arith.constant 0 : i32
    return %arg0, %c0_i32 : i32, i32
  }
  func.func @transform_1(%arg0: i32) -> (i32, i32) {
    %c0_i32 = arith.constant 0 : i32
    %c0_i32_0 = arith.constant 0 : i32
    %c0_i32_1 = arith.constant 0 : i32
    return %c0_i32, %c0_i32_0 : i32, i32
  }
  func.func @transform_2(%arg0: i32) -> (i32, i32) {
    %c0_i32 = arith.constant 0 : i32
    %c0_i32_0 = arith.constant 0 : i32
    %c0_i32_1 = arith.constant 0 : i32
    return %c0_i32, %c0_i32_0 : i32, i32
  }
  func.func @transform_3(%arg0: i32) -> (i32, i32) {
    %c0_i32 = arith.constant 0 : i32
    %c0_i32_0 = arith.constant 0 : i32
    %c0_i32_1 = arith.constant 0 : i32
    return %c0_i32, %c0_i32_0 : i32, i32
  }
  func.func @transform_4(%arg0: i32) -> (i32, i32) {
    %c0_i32 = arith.constant 0 : i32
    %c0_i32_0 = arith.constant 0 : i32
    %c0_i32_1 = arith.constant 0 : i32
    return %c0_i32, %c0_i32_0 : i32, i32
  }
  func.func @transform_5(%arg0: i32) -> (i32, i32) {
    %c0_i32 = arith.constant 0 : i32
    %c0_i32_0 = arith.constant 0 : i32
    %c0_i32_1 = arith.constant 0 : i32
    return %c0_i32, %c0_i32_0 : i32, i32
  }
  func.func @transform_6(%arg0: i32) -> (i32, i32) {
    %c0_i32 = arith.constant 0 : i32
    %c0_i32_0 = arith.constant 0 : i32
    return %arg0, %c0_i32 : i32, i32
  }
}

</mosaic_0001>

<bundles_post_ra>
// kernel: tpu_custom_call.1
= control target key start
LH: loop header
LB: loop body
LE: loop exit
PB: predicated region body
PF: predicated region fallthrough
CT: control target
= control target key end

     0   :  { %s1614_s21 = smov 0   ;;  %s1901_s0 = inlined_call_operand.vmem [shape: bf16[512,32], index: 0, kind: input, shape index: {}]   ;;  %s1902_s1 = inlined_call_operand.vmem [shape: bf16[32,96], index: 1, kind: input, shape index: {}]   ;;  %s1903_s2 = inlined_call_operand.vmem [shape: f32[1,96], index: 2, kind: input, shape index: {}]   ;;  %s1904_s3 = inlined_call_operand.vmem [shape: f32[64,64], index: 3, kind: input, shape index: {}]   ;;  %s1905_s4 = inlined_call_operand.vmem [shape: bf16[32,32], index: 4, kind: input, shape index: {}]   ;;  %s1906_s5 = inlined_call_operand.vmem [shape: f32[1,32], index: 5, kind: input, shape index: {}]   ;;  %s1907_s6 = inlined_call_operand.vmem [shape: f32[512,32], index: 6, kind: output, shape index: {}]  }
   0x1 LB: > { %s1262_s22 = sadd.s32 4294967295, %s1575_s21   ;;  %p1266_p0 = scmp.ge.s32.totalorder %s1575_s21, 1  ;;  %s1575_s21 = sphi %s1614_s21, %s16_s21  }
   0x2   : > { %p213_p1 = scmp.lt.s32.totalorder %s1575_s21, 5 }
   0x4   : > { %p214_p2 = pnand %p1266_p0, %p213_p1 }
   0x5   : > { %v1493_v0 = vld [vmem:[%s1902_s1] sm:$0xff] (!%p214_p2)   ;;  %s1267_s25 = sshll.u32 (!%p214_p2), %s1262_s22, 4  ;;  %v1494_v1 = vld [vmem:[%s1902_s1 + $0x8] sm:$0xff] (!%p214_p2)   ;;  %vm335_vm0 = vcmask (!%p214_p2), 261120   ;;  %s1577_s10 = smov (!%p214_p2), 96   ;;  %vm675_vm1 = vcmask (!%p214_p2), 523264  }
   0x6   : > { %217 = sbr.rel (%p214_p2) target bundleno = 1248 (0x4e0), region = 44  ;;  %p244_p3 = scmp.lt.s32.totalorder (!%p214_p2), %s1267_s25, 63  ;;  %1371 = vmatprep.subr.bf16.mxu0 (!%p214_p2), %v1493_v0  ;;  %v1271_v11 = vld [vmem:[%s1903_s2] ss:$0 sm:$0xff] (!%p214_p2) }
   0x7   : > { %1372 = vmatpush3.bf16.msra.mxu0 (!%p214_p2), %v1493_v0  ;;  %s1578_s11 = smov (!%p214_p2), 64  }
   0x8   : > { %1373 = vmatprep.subr.bf16.mxu0 (!%p214_p2), %v1494_v1 }
   0xb   : > { %1374 = vmatpush3.bf16.msra.mxu0 (!%p214_p2), %v1494_v1 }
   0xd   : > { %s1909_s25 = smov (!%p244_p3, %s1267_s25), 63 }
   0xe   : > { %s1268_s28 = sshll.u32 %s1909_s25, 2 }
   0xf   : > { %s247_s7 = scalar_lea.vmem %s1901_s0, %s1268_s28 }
  0x10   : > { %v1495_v2 = vld [vmem:[%s247_s7] sm:$0xff]   ;;  %v1496_v3 = vld [vmem:[%s247_s7 + $0x8] sm:$0xff]   ;;  %v1497_v4 = vld [vmem:[%s247_s7 + $0x10] sm:$0xff]  }
  0x11   : > { %1375 = vmatprep.mubr.msk.bf16.mxu0 %vm335_vm0, %v1495_v2  ;;  %v1498_v5 = vld [vmem:[%s247_s7 + $0x18] sm:$0xff]   ;;  %v1499_v6 = vld [vmem:[%s247_s7 + $0x20] sm:$0xff]   ;;  %v1500_v7 = vld [vmem:[%s247_s7 + $0x28] sm:$0xff]  }
  0x12   : > { %1376 = vmatmul.mubr.msk.bf16.vlgmr.msra.gmra.mrb[0].mxu0 %vm335_vm0, %v1496_v3  ;;  %v1501_v8 = vld [vmem:[%s247_s7 + $0x30] sm:$0xff]   ;;  %v1502_v9 = vld [vmem:[%s247_s7 + $0x38] sm:$0xff]  }
  0x13   : > { %1379 = vmatprep.mubr.msk.bf16.mxu0 %vm335_vm0, %v1497_v4 }
  0x1a   : > { %1380 = vmatmul.mubr.msk.bf16.gmra.mrb[4].mxu0 %vm335_vm0, %v1498_v5 }
  0x1b   : > { %1383 = vmatprep.mubr.msk.bf16.mxu0 %vm335_vm0, %v1499_v6 }
  0x22   : > { %1384 = vmatmul.mubr.msk.bf16.gmra.mrb[8].mxu0 %vm335_vm0, %v1500_v7  ;;  %v467_v7 = vld [vmem:[%s1904_s3 + $0x10] sm:$0xff] }
  0x23   : > { %1387 = vmatprep.mubr.msk.bf16.mxu0 %vm335_vm0, %v1501_v8 }
  0x2a   : > { %1388 = vmatmul.mubr.msk.bf16.gmra.mrb[12].mxu0 %vm335_vm0, %v1502_v9  ;;  %v465_v9 = vld [vmem:[%s1904_s3] sm:$0xff] }
  0xe5   : > { %v1377_v10 = vpop.f32.mrb[0].mxu0 }
  0xe6   : > { %v394_v12 = vpop.f32.mrb[1].mxu0  ;;  %v403_v14 = vadd.f32 %v1377_v10, %v1271_v11 }
  0xe7   : > { %v1378_v13 = vpop.f32.mrb[2].mxu0  ;;  %v395_v17 = vadd.f32 %v1271_v11, %v394_v12  ;;  %v466_v12 = vld [vmem:[%s1904_s3 + $0x8] sm:$0xff] }
  0xe8   : > { %v406_v15 = vadd.f32 %v1378_v13, %v1271_v11  ;;  %v397_v16 = vpop.f32.mrb[3].mxu0 }
  0xe9   : > { %v398_v18 = vadd.f32 %v1271_v11, %v397_v16 }
  0xea   : > { %v1645_v19 = vpack.c.bf16 %v406_v15, %v403_v14 }
  0xeb   : > { %v457_v20 = vpack.c.bf16 %v398_v18, %v395_v17  ;;  %v468_v17 = vld [vmem:[%s1904_s3 + $0x18] sm:$0xff] }
  0xed   : > { %477 = vrot.lane.b32.xlu0 %v457_v20, %s1577_s10  ;;  %1399 = vmatprep.mubr.msk.bf16.mxu1 %vm335_vm0, %v457_v20  ;;  %v1381_v21 = vpop.f32.mrb[4].mxu0 }
  0xee   : > { %v419_v22 = vadd.f32 %v1381_v21, %v1271_v11  ;;  %v410_v23 = vpop.f32.mrb[5].mxu0 }
  0xef   : > { %v411_v24 = vadd.f32 %v1271_v11, %v410_v23  ;;  %v1382_v25 = vpop.f32.mrb[6].mxu0 }
  0xf0   : > { %v422_v26 = vadd.f32 %v1382_v25, %v1271_v11  ;;  %v413_v27 = vpop.f32.mrb[7].mxu0  ;;  %v472_v25 = vld [vmem:[%s1904_s3 + $0x38] sm:$0xff] }
  0xf1   : > { %v414_v28 = vadd.f32 %v1271_v11, %v413_v27  ;;  %479 = vrot.lane.b32.xlu0 %v1645_v19, %s1577_s10 }
  0xf2   : > { %v1651_v29 = vpack.c.bf16 %v422_v26, %v419_v22 }
  0xf3   : > { %v459_v30 = vpack.c.bf16 %v414_v28, %v411_v24  ;;  %v469_v24 = vld [vmem:[%s1904_s3 + $0x20] sm:$0xff] }
  0xf5   : > { %v1385_v31 = vpop.f32.mrb[8].mxu0  ;;  %481 = vrot.lane.b32.xlu1 %v459_v30, %s1577_s10  ;;  %483 = vrot.lane.b32.xlu0 %v1651_v29, %s1577_s10 }
  0xf6   : > { %v435_v32 = vadd.f32 %v1385_v31, %v1271_v11  ;;  %v426_v33 = vpop.f32.mrb[9].mxu0 }
  0xf7   : > { %v427_v34 = vadd.f32 %v1271_v11, %v426_v33  ;;  %v1386_v35 = vpop.f32.mrb[10].mxu0 }
  0xf8   : > { %v438_v36 = vadd.f32 %v1386_v35, %v1271_v11  ;;  %v429_v37 = vpop.f32.mrb[11].mxu0 }
  0xf9   : > { %v430_v38 = vadd.f32 %v1271_v11, %v429_v37 }
  0xfa   : > { %v1656_v39 = vpack.c.bf16 %v438_v36, %v435_v32 }
  0xfb   : > { %v1658_v40 = vpack.c.bf16 %v430_v38, %v427_v34  ;;  %v470_v34 = vld [vmem:[%s1904_s3 + $0x28] sm:$0xff] }
  0xfd   : > { %v1389_v41 = vpop.f32.mrb[12].mxu0  ;;  %578 = vrot.lane.b32.xlu1 %v1658_v40, %s1577_s10  ;;  %1415 = vmatprep.mubr.msk.bf16.mxu0 %vm335_vm0, %v1658_v40 }
  0xfe   : > { %v451_v42 = vadd.f32 %v1389_v41, %v1271_v11  ;;  %v442_v43 = vpop.f32.mrb[13].mxu0 }
  0xff   : > { %v443_v44 = vadd.f32 %v1271_v11, %v442_v43  ;;  %v1390_v45 = vpop.f32.mrb[14].mxu0 }
 0x100   : > { %v454_v46 = vadd.f32 %v1390_v45, %v1271_v11  ;;  %v445_v47 = vpop.f32.mrb[15].mxu0 }
 0x101   : > { %v446_v48 = vadd.f32 %v1271_v11, %v445_v47  ;;  %580 = vrot.lane.b32.xlu1 %v1656_v39, %s1577_s10 }
 0x102   : > { %v1666_v49 = vpack.c.bf16 %v454_v46, %v451_v42 }
 0x103   : > { %v1668_v50 = vpack.c.bf16 %v446_v48, %v443_v44 }
 0x105   : > { %584 = vrot.lane.b32.xlu1 %v1666_v49, %s1577_s10  ;;  %582 = vrot.lane.b32.xlu0 %v1668_v50, %s1577_s10  ;;  %s1270_s10 = sshll.u32 %s1909_s25, 3 }
 0x106   : > { %s1864_s15 = scalar_lea.vmem %s1907_s6, %s1270_s10 }
 0x109   : > { %828 = vrot.lane.b32.xlu1 %v457_v20, %s1578_s11  ;;  %830 = vrot.lane.b32.xlu0 %v1645_v19, %s1578_s11  ;;  %v471_v20 = vld [vmem:[%s1904_s3 + $0x30] sm:$0xff] }
 0x10d   : > { %832 = vrot.lane.b32.xlu1 %v459_v30, %s1578_s11 }
 0x111   : > { %834 = vrot.lane.b32.xlu1 %v1651_v29, %s1578_s11 }
 0x15f   : > { %v478_v51 = vpop.permute.xlu0 %477 }
 0x160   : > { %1475 = vmatprep.subr.msk.bf16.mxu1 %vm335_vm0, %v478_v51  ;;  %v498_v52 = vsel %vm335_vm0, %v478_v51, 0 }
 0x161   : > { %1392 = vmatpush3.bf16.xpose.msra.mxu1 %v498_v52 }
 0x163   : > { %v480_v53 = vpop.permute.xlu0 %479 }
 0x164   : > { %1476 = vmatprep.subr.msk.bf16.mxu1 %vm335_vm0, %v480_v53  ;;  %v501_v55 = vsel %vm335_vm0, %v480_v53, 0 }
 0x167   : > { %v482_v54 = vpop.permute.xlu1 %481  ;;  %v484_v59 = vpop.permute.xlu0 %483 }
 0x168   : > { %v504_v58 = vsel %vm335_vm0, %v482_v54, 0  ;;  %v507_v62 = vsel %vm335_vm0, %v484_v59, 0 }
 0x169   : > { %1394 = vmatpush3.bf16.xpose.msra.mxu1 %v501_v55 }
 0x16a   : > { %1477 = vmatprep.subr.msk.bf16.mxu1 %vm335_vm0, %v482_v54 }
 0x16f   : > { %v579_v56 = vpop.permute.xlu1 %578 }
 0x170   : > { %v599_v57 = vsel %vm335_vm0, %v579_v56, 0  ;;  %1479 = vmatprep.subr.msk.bf16.mxu0 %vm335_vm0, %v579_v56 }
 0x171   : > { %1396 = vmatpush3.bf16.xpose.msra.mxu1 %v504_v58  ;;  %1408 = vmatpush3.bf16.xpose.msra.mxu0 %v599_v57 }
 0x172   : > { %1478 = vmatprep.subr.msk.bf16.mxu1 %vm335_vm0, %v484_v59 }
 0x173   : > { %v581_v60 = vpop.permute.xlu1 %580 }
 0x174   : > { %1480 = vmatprep.subr.msk.bf16.mxu0 %vm335_vm0, %v581_v60  ;;  %v602_v61 = vsel %vm335_vm0, %v581_v60, 0 }
 0x177   : > { %v583_v63 = vpop.permute.xlu0 %582  ;;  %v585_v1 = vpop.permute.xlu1 %584 }
 0x178   : > { %v605_v0 = vsel %vm335_vm0, %v583_v63, 0  ;;  %v608_v2 = vsel %vm335_vm0, %v585_v1, 0 }
 0x179   : > { %1398 = vmatpush3.bf16.xpose.msra.mxu1 %v507_v62  ;;  %1410 = vmatpush3.bf16.xpose.msra.mxu0 %v602_v61 }
 0x17a   : > { %1481 = vmatprep.subr.msk.bf16.mxu0 %vm335_vm0, %v583_v63 }
 0x17b   : > { %v829_v3 = vpop.permute.xlu1 %828  ;;  %v831_v4 = vpop.permute.xlu0 %830 }
 0x17f   : > { %v833_v5 = vpop.permute.xlu1 %832 }
 0x180   : > { %1400 = vmatmul.mubr.msk.bf16.vlgmr.msra.gmra.mrb[0].mxu1 %vm335_vm0, %v1645_v19 }
 0x181   : > { %1403 = vmatprep.mubr.msk.bf16.mxu1 %vm335_vm0, %v459_v30  ;;  %1412 = vmatpush3.bf16.xpose.msra.mxu0 %v605_v0 }
 0x182   : > { %1482 = vmatprep.subr.msk.bf16.mxu0 %vm335_vm0, %v585_v1 }
 0x183   : > { %v835_v6 = vpop.permute.xlu1 %834 }
 0x188   : > { %1404 = vmatmul.mubr.msk.bf16.gmra.mrb[4].mxu1 %vm335_vm0, %v1651_v29 }
 0x189   : > { %1414 = vmatpush3.bf16.xpose.msra.mxu0 %v608_v2 }
 0x18a   : > { %1423 = vmatprep.subr.bf16.mxu0 %v829_v3 }
 0x190   : > { %1416 = vmatmul.mubr.msk.bf16.vlgmr.msra.gmra.mrb[16].mxu0 %vm335_vm0, %v1656_v39 }
 0x191   : > { %1419 = vmatprep.mubr.msk.bf16.mxu0 %vm335_vm0, %v1668_v50  ;;  %1424 = vmatpush3.bf16.msra.mxu0 %v829_v3 }
 0x192   : > { %1425 = vmatprep.subr.bf16.mxu0 %v831_v4 }
 0x195   : > { %1426 = vmatpush3.bf16.msra.mxu0 %v831_v4 }
 0x196   : > { %1427 = vmatprep.subr.bf16.mxu0 %v833_v5 }
 0x198   : > { %1420 = vmatmul.mubr.msk.bf16.gmra.mrb[20].mxu0 %vm335_vm0, %v1666_v49 }
 0x199   : > { %1428 = vmatpush3.bf16.msra.mxu0 %v833_v5 }
 0x19a   : > { %1429 = vmatprep.subr.bf16.mxu0 %v835_v6 }
 0x19d   : > { %1430 = vmatpush3.bf16.msra.mxu0 %v835_v6 }
 0x253   : > { %v1401_v8 = vpop.f32.mrb[0].mxu1 }
 0x254   : > { %v1713_v10 = vadd.f32 %v1401_v8, %v467_v7  ;;  %v543_v11 = vpop.f32.mrb[1].mxu1 }
 0x255   : > { %v1402_v13 = vpop.f32.mrb[2].mxu1  ;;  %v1718_v14 = vadd.f32 %v543_v11, %v465_v9 }
 0x256   : > { %v546_v15 = vpop.f32.mrb[3].mxu1  ;;  %v682_v16 = vsel %vm675_vm1, %v1713_v10, -inf  ;;  %v1732_v21 = vadd.f32 %v1402_v13, %v468_v17 }
 0x257   : > { %v1725_v18 = vadd.f32 %v546_v15, %v466_v12  ;;  %683 = vmax.xlane.f32.xlu0 %v682_v16  ;;  %v676_v22 = vsel %vm675_vm1, %v1718_v14, -inf }
 0x258   : > { %v685_v33 = vsel %vm675_vm1, %v1732_v21, -inf }
 0x259   : > { %v679_v19 = vsel %vm675_vm1, %v1725_v18, -inf }
 0x25a   : > { %680 = vmax.xlane.f32.xlu1 %v679_v19 }
 0x25b   : > { %v1405_v23 = vpop.f32.mrb[4].mxu1  ;;  %677 = vmax.xlane.f32.xlu0 %v676_v22 }
 0x25c   : > { %v1742_v26 = vadd.f32 %v1405_v23, %v471_v20  ;;  %v559_v27 = vpop.f32.mrb[5].mxu1 }
 0x25d   : > { %v1406_v28 = vpop.f32.mrb[6].mxu1  ;;  %v1744_v29 = vadd.f32 %v559_v27, %v469_v24 }
 0x25e   : > { %v1746_v30 = vadd.f32 %v1406_v28, %v472_v25  ;;  %v562_v31 = vpop.f32.mrb[7].mxu1  ;;  %v694_v32 = vsel %vm675_vm1, %v1742_v26, -inf }
 0x25f   : > { %695 = vmax.xlane.f32.xlu1 %v694_v32  ;;  %686 = vmax.xlane.f32.xlu0 %v685_v33  ;;  %v1755_v35 = vadd.f32 %v562_v31, %v470_v34  ;;  %v688_v36 = vsel %vm675_vm1, %v1744_v29, -inf }
 0x260   : > { %v697_v37 = vsel %vm675_vm1, %v1746_v30, -inf }
 0x261   : > { %v691_v46 = vsel %vm675_vm1, %v1755_v35, -inf }
 0x263   : > { %v1417_v38 = vpop.f32.mrb[16].mxu0  ;;  %689 = vmax.xlane.f32.xlu1 %v688_v36  ;;  %698 = vmax.xlane.f32.xlu0 %v697_v37 }
 0x264   : > { %v644_v41 = vpop.f32.mrb[17].mxu0  ;;  %v1763_v44 = vadd.f32 %v1417_v38, %v467_v7 }
 0x265   : > { %v1761_v42 = vadd.f32 %v644_v41, %v465_v9  ;;  %v1418_v43 = vpop.f32.mrb[18].mxu0 }
 0x266   : > { %v647_v45 = vpop.f32.mrb[19].mxu0  ;;  %v1769_v48 = vadd.f32 %v1418_v43, %v468_v17  ;;  %v706_v51 = vsel %vm675_vm1, %v1763_v44, -inf }
 0x267   : > { %692 = vmax.xlane.f32.xlu0 %v691_v46  ;;  %v700_v47 = vsel %vm675_vm1, %v1761_v42, -inf  ;;  %v1775_v56 = vadd.f32 %v647_v45, %v466_v12 }
 0x268   : > { %701 = vmax.xlane.f32.xlu1 %v700_v47  ;;  %v709_v58 = vsel %vm675_vm1, %v1769_v48, -inf }
 0x269   : > { %v703_v61 = vsel %vm675_vm1, %v1775_v56, -inf }
 0x26b   : > { %v1421_v52 = vpop.f32.mrb[20].mxu0  ;;  %707 = vmax.xlane.f32.xlu0 %v706_v51 }
 0x26c   : > { %v660_v53 = vpop.f32.mrb[21].mxu0  ;;  %v1781_v60 = vadd.f32 %v1421_v52, %v471_v20 }
 0x26d   : > { %v1773_v54 = vadd.f32 %v660_v53, %v469_v24  ;;  %v1422_v55 = vpop.f32.mrb[22].mxu0 }
 0x26e   : > { %v663_v57 = vpop.f32.mrb[23].mxu0  ;;  %v1785_v62 = vadd.f32 %v1422_v55, %v472_v25  ;;  %v718_v63 = vsel %vm675_vm1, %v1781_v60, -inf }
 0x26f   : > { %710 = vmax.xlane.f32.xlu0 %v709_v58  ;;  %v712_v59 = vsel %vm675_vm1, %v1773_v54, -inf  ;;  %v1789_v0 = vadd.f32 %v663_v57, %v470_v34 }
 0x270   : > { %713 = vmax.xlane.f32.xlu1 %v712_v59  ;;  %v721_v1 = vsel %vm675_vm1, %v1785_v62, -inf }
 0x271   : > { %v715_v2 = vsel %vm675_vm1, %v1789_v0, -inf }
 0x273   : > { %704 = vmax.xlane.f32.xlu0 %v703_v61 }
 0x277   : > { %719 = vmax.xlane.f32.xlu0 %v718_v63 }
 0x27b   : > { %722 = vmax.xlane.f32.xlu0 %v721_v1 }
 0x27f   : > { %716 = vmax.xlane.f32.xlu0 %v715_v2 }
 0x281   : > { %919 = vrot.lane.b32.xlu1 %v1656_v39, %s1578_s11 }
 0x285   : > { %921 = vrot.lane.b32.xlu1 %v1668_v50, %s1578_s11 }
 0x289   : > { %923 = vrot.lane.b32.xlu1 %v1666_v49, %s1578_s11 }
 0x295   : > { %917 = vrot.lane.b32.xlu0 %v1658_v40, %s1578_s11 }
 0x2e4   : > { %v684_v3 = vpop.xlane.xlu0 %683 }
 0x2e5   : > { %v726_v4 = vsub.f32 %v1713_v10, %v684_v3 }
 0x2e7   : > { %v681_v5 = vpop.xlane.xlu1 %680  ;;  %v744_v39 = vmul.f32 1.442695, %v726_v4 }
 0x2e8   : > { %v725_v6 = vsub.f32 %v1725_v18, %v681_v5  ;;  %v678_v7 = vpop.xlane.xlu0 %677 }
 0x2e9   : > { %v724_v8 = vsub.f32 %v1718_v14, %v678_v7 }
 0x2ea   : > { %v742_v9 = vmul.f32 1.442695, %v725_v6 }
 0x2eb   : > { %v740_v11 = vmul.f32 1.442695, %v724_v8 }
 0x2ec   : > { %1505 = vpow2.f32 %v742_v9  ;;  %v696_v50 = vpop.xlane.xlu1 %695  ;;  %v687_v12 = vpop.xlane.xlu0 %686 }
 0x2ed   : > { %1507 = vpow2.f32 %v740_v11  ;;  %v727_v49 = vsub.f32 %v1732_v21, %v687_v12  ;;  %v730_v40 = vsub.f32 %v1742_v26, %v696_v50 }
 0x2ee   : > { %1509 = vpow2.f32 %v744_v39 }
 0x2ef   : > { %v746_v13 = vmul.f32 1.442695, %v727_v49  ;;  %v752_v14 = vmul.f32 1.442695, %v730_v40 }
 0x2f0   : > { %v690_v10 = vpop.xlane.xlu1 %689  ;;  %v699_v15 = vpop.xlane.xlu0 %698 }
 0x2f1   : > { %v728_v16 = vsub.f32 %v1744_v29, %v690_v10  ;;  %v731_v17 = vsub.f32 %v1746_v30, %v699_v15  ;;  %1511 = vpow2.f32 %v746_v13 }
 0x2f3   : > { %v748_v18 = vmul.f32 1.442695, %v728_v16  ;;  %v754_v19 = vmul.f32 1.442695, %v731_v17 }
 0x2f4   : > { %v693_v20 = vpop.xlane.xlu0 %692 }
 0x2f5   : > { %1513 = vpow2.f32 %v748_v18  ;;  %v729_v22 = vsub.f32 %v1755_v35, %v693_v20  ;;  %v702_v23 = vpop.xlane.xlu1 %701 }
 0x2f6   : > { %v1506_v21 = vpop.eup %1505  ;;  %v732_v24 = vsub.f32 %v1761_v42, %v702_v23  ;;  %1515 = vpow2.f32 %v752_v14 }
 0x2f7   : > { %v1508_v25 = vpop.eup %1507  ;;  %v750_v26 = vmul.f32 1.442695, %v729_v22  ;;  %v775_v27 = vsel %vm675_vm1, %v1506_v21, 0.0  ;;  %1517 = vpow2.f32 %v754_v19 }
 0x2f8   : > { %v756_v28 = vmul.f32 1.442695, %v732_v24  ;;  %776 = vadd.xlane.f32.xlu0 %v775_v27  ;;  %v708_v29 = vpop.xlane.xlu0 %707  ;;  %v772_v30 = vsel %vm675_vm1, %v1508_v25, 0.0  ;;  %v820_v31 = vpack.c.bf16 %v1506_v21, %v1508_v25  ;;  %v1510_v32 = vpop.eup %1509  ;;  %v1503_v27 = vld [vmem:[%s1905_s4] sm:$0xff]  }
 0x2f9   : > { %1519 = vpow2.f32 %v750_v26  ;;  %v734_v33 = vsub.f32 %v1763_v44, %v708_v29  ;;  %773 = vadd.xlane.f32.xlu1 %v772_v30  ;;  %v778_v37 = vsel %vm675_vm1, %v1510_v32, 0.0  ;;  %1455 = vmatprep.subr.bf16.mxu1 %v1503_v27 }
 0x2fa   : > { %1431 = vmatprep.mubr.msk.bf16.mxu0 %vm675_vm1, %v820_v31  ;;  %1521 = vpow2.f32 %v756_v28  ;;  %1456 = vmatpush3.bf16.msra.mxu1 %v1503_v27  ;;  %v1504_v28 = vld [vmem:[%s1905_s4 + $0x8] sm:$0xff]  }
 0x2fb   : > { %v760_v34 = vmul.f32 1.442695, %v734_v33  ;;  %v1512_v35 = vpop.eup %1511  ;;  %1457 = vmatprep.subr.bf16.mxu1 %v1504_v28 }
 0x2fc   : > { %v711_v36 = vpop.xlane.xlu0 %710  ;;  %v821_v38 = vpack.c.bf16 %v1512_v35, %v1510_v32  ;;  %v781_v42 = vsel %vm675_vm1, %v1512_v35, 0.0 }
 0x2fd   : > { %v714_v41 = vpop.xlane.xlu1 %713  ;;  %779 = vadd.xlane.f32.xlu1 %v778_v37  ;;  %782 = vadd.xlane.f32.xlu0 %v781_v42  ;;  %1523 = vpow2.f32 %v760_v34  ;;  %v735_v44 = vsub.f32 %v1769_v48, %v711_v36 }
 0x2fe   : > { %v736_v43 = vsub.f32 %v1773_v54, %v714_v41  ;;  %1432 = vmatmul.mubr.msk.bf16.vlgmr.msra.gmra.mrb[24].mxu0 %vm675_vm1, %v821_v38  ;;  %1458 = vmatpush3.bf16.msra.mxu1 %v1504_v28 }
 0x2ff   : > { %v1514_v45 = vpop.eup %1513  ;;  %v762_v58 = vmul.f32 1.442695, %v735_v44 }
 0x300   : > { %v764_v46 = vmul.f32 1.442695, %v736_v43  ;;  %v705_v47 = vpop.xlane.xlu0 %704  ;;  %v784_v51 = vsel %vm675_vm1, %v1514_v45, 0.0  ;;  %v1516_v52 = vpop.eup %1515 }
 0x301   : > { %v733_v53 = vsub.f32 %v1775_v56, %v705_v47  ;;  %785 = vadd.xlane.f32.xlu1 %v784_v51  ;;  %v1518_v55 = vpop.eup %1517  ;;  %v790_v61 = vsel %vm675_vm1, %v1516_v52, 0.0  ;;  %v920_v12 = vpop.permute.xlu1 %919 }
 0x302   : > { %1525 = vpow2.f32 %v764_v46  ;;  %v823_v3 = vpack.c.bf16 %v1518_v55, %v1516_v52  ;;  %v793_v6 = vsel %vm675_vm1, %v1518_v55, 0.0 }
 0x303   : > { %v1520_v57 = vpop.eup %1519  ;;  %v758_v54 = vmul.f32 1.442695, %v733_v53 }
 0x304   : > { %v720_v59 = vpop.xlane.xlu0 %719  ;;  %v787_v48 = vsel %vm675_vm1, %v1520_v57, 0.0  ;;  %v822_v63 = vpack.c.bf16 %v1520_v57, %v1514_v45  ;;  %v1522_v1 = vpop.eup %1521 }
 0x305   : > { %1527 = vpow2.f32 %v758_v54  ;;  %v738_v2 = vsub.f32 %v1781_v60, %v720_v59  ;;  %791 = vadd.xlane.f32.xlu1 %v790_v61  ;;  %788 = vadd.xlane.f32.xlu0 %v787_v48  ;;  %v796_v5 = vsel %vm675_vm1, %v1522_v1, 0.0  ;;  %v922_v18 = vpop.permute.xlu1 %921 }
 0x306   : > { %1435 = vmatprep.mubr.msk.bf16.mxu0 %vm675_vm1, %v822_v63  ;;  %1529 = vpow2.f32 %v762_v58 }
 0x307   : > { %v768_v56 = vmul.f32 1.442695, %v738_v2  ;;  %1436 = vmatmul.mubr.msk.bf16.gmra.mrb[28].mxu0 %vm675_vm1, %v823_v3  ;;  %v1524_v7 = vpop.eup %1523 }
 0x308   : > { %v723_v4 = vpop.xlane.xlu0 %722  ;;  %v802_v9 = vsel %vm675_vm1, %v1524_v7, 0.0 }
 0x309   : > { %1531 = vpow2.f32 %v768_v56  ;;  %797 = vadd.xlane.f32.xlu1 %v796_v5  ;;  %794 = vadd.xlane.f32.xlu0 %v793_v6  ;;  %v739_v60 = vsub.f32 %v1785_v62, %v723_v4  ;;  %v924_v20 = vpop.permute.xlu1 %923 }
 0x30b   : > { %v770_v49 = vmul.f32 1.442695, %v739_v60 }
 0x30c   : > { %v717_v8 = vpop.xlane.xlu0 %716  ;;  %v1526_v39 = vpop.eup %1525 }
 0x30d   : > { %v737_v11 = vsub.f32 %v1789_v0, %v717_v8  ;;  %803 = vadd.xlane.f32.xlu1 %v802_v9  ;;  %v808_v10 = vsel %vm675_vm1, %v1526_v39, 0.0 }
 0x30f   : > { %v1528_v50 = vpop.eup %1527  ;;  %v766_v40 = vmul.f32 1.442695, %v737_v11 }
 0x310   : > { %v918_v13 = vpop.permute.xlu0 %917  ;;  %v799_v15 = vsel %vm675_vm1, %v1528_v50, 0.0  ;;  %v824_v16 = vpack.c.bf16 %v1528_v50, %v1522_v1  ;;  %v1530_v17 = vpop.eup %1529 }
 0x311   : > { %1533 = vpow2.f32 %v766_v40  ;;  %809 = vadd.xlane.f32.xlu1 %v808_v10  ;;  %800 = vadd.xlane.f32.xlu0 %v799_v15  ;;  %v805_v0 = vsel %vm675_vm1, %v1530_v17, 0.0  ;;  %v825_v21 = vpack.c.bf16 %v1530_v17, %v1524_v7 }
 0x312   : > { %1439 = vmatprep.subr.bf16.mxu0 %v918_v13  ;;  %1447 = vmatprep.mubr.msk.bf16.mxu0 %vm675_vm1, %v824_v16  ;;  %1535 = vpow2.f32 %v770_v49 }
 0x313   : > { %v1532_v62 = vpop.eup %1531  ;;  %1440 = vmatpush3.bf16.msra.mxu0 %v918_v13 }
 0x314   : > { %1441 = vmatprep.subr.bf16.mxu0 %v920_v12  ;;  %v814_v14 = vsel %vm675_vm1, %v1532_v62, 0.0 }
 0x315   : > { %806 = vadd.xlane.f32.xlu0 %v805_v0  ;;  %815 = vadd.xlane.f32.xlu1 %v814_v14 }
 0x317   : > { %1442 = vmatpush3.bf16.msra.mxu0 %v920_v12 }
 0x318   : > { %1443 = vmatprep.subr.bf16.mxu0 %v922_v18 }
 0x31b   : > { %v1534_v19 = vpop.eup %1533  ;;  %1444 = vmatpush3.bf16.msra.mxu0 %v922_v18 }
 0x31c   : > { %1445 = vmatprep.subr.bf16.mxu0 %v924_v20  ;;  %v811_v22 = vsel %vm675_vm1, %v1534_v19, 0.0  ;;  %v1536_v23 = vpop.eup %1535  ;;  %v826_v25 = vpack.c.bf16 %v1534_v19, %v1526_v39 }
 0x31d   : > { %812 = vadd.xlane.f32.xlu0 %v811_v22  ;;  %v817_v24 = vsel %vm675_vm1, %v1536_v23, 0.0  ;;  %v827_v26 = vpack.c.bf16 %v1536_v23, %v1532_v62 }
 0x31f   : > { %1446 = vmatpush3.bf16.msra.mxu0 %v924_v20 }
 0x321   : > { %818 = vadd.xlane.f32.xlu0 %v817_v24 }
 0x322   : > { %1448 = vmatmul.mubr.msk.bf16.vlgmr.msra.gmra.mrb[32].mxu0 %vm675_vm1, %v825_v21 }
 0x323   : > { %1451 = vmatprep.mubr.msk.bf16.mxu0 %vm675_vm1, %v826_v25 }
 0x32a   : > { %1452 = vmatmul.mubr.msk.bf16.gmra.mrb[36].mxu0 %vm675_vm1, %v827_v26 }
 0x385   : > { %v777_v30 = vpop.xlane.xlu0 %776 }
 0x386   : > { %v774_v29 = vpop.xlane.xlu1 %773  ;;  %1537 = vrcp.f32 %v777_v30 }
 0x38a   : > { %v780_v31 = vpop.xlane.xlu1 %779  ;;  %v783_v32 = vpop.xlane.xlu0 %782 }
 0x38b   : > { %1539 = vrcp.f32 %v780_v31 }
 0x38c   : > { %1541 = vrcp.f32 %v783_v32 }
 0x38d   : > { %1543 = vrcp.f32 %v774_v29 }
 0x38e   : > { %v786_v33 = vpop.xlane.xlu1 %785 }
 0x38f   : > { %1545 = vrcp.f32 %v786_v33 }
 0x390   : > { %v1538_v37 = vpop.eup %1537 }
 0x392   : > { %v789_v34 = vpop.xlane.xlu0 %788  ;;  %v792_v35 = vpop.xlane.xlu1 %791 }
 0x393   : > { %1547 = vrcp.f32 %v792_v35 }
 0x395   : > { %v1540_v41 = vpop.eup %1539 }
 0x396   : > { %v795_v36 = vpop.xlane.xlu0 %794  ;;  %v1542_v43 = vpop.eup %1541 }
 0x397   : > { %1549 = vrcp.f32 %v795_v36  ;;  %v1544_v44 = vpop.eup %1543  ;;  %v798_v6 = vpop.xlane.xlu1 %797 }
 0x398   : > { %1551 = vrcp.f32 %v789_v34 }
 0x399   : > { %v1546_v58 = vpop.eup %1545  ;;  %1553 = vrcp.f32 %v798_v6 }
 0x39b   : > { %v804_v9 = vpop.xlane.xlu1 %803 }
 0x39c   : > { %1555 = vrcp.f32 %v804_v9 }
 0x39d   : > { %v1548_v59 = vpop.eup %1547 }
 0x39e   : > { %v801_v8 = vpop.xlane.xlu0 %800 }
 0x39f   : > { %v810_v11 = vpop.xlane.xlu1 %809 }
 0x3a1   : > { %v1550_v48 = vpop.eup %1549 }
 0x3a2   : > { %v1552_v1 = vpop.eup %1551  ;;  %v807_v39 = vpop.xlane.xlu0 %806 }
 0x3a3   : > { %1557 = vrcp.f32 %v807_v39  ;;  %v816_v12 = vpop.xlane.xlu1 %815  ;;  %v1554_v40 = vpop.eup %1553 }
 0x3a4   : > { %1559 = vrcp.f32 %v801_v8 }
 0x3a5   : > { %1561 = vrcp.f32 %v810_v11 }
 0x3a6   : > { %1563 = vrcp.f32 %v816_v12  ;;  %v1556_v10 = vpop.eup %1555 }
 0x3aa   : > { %v813_v50 = vpop.xlane.xlu0 %812 }
 0x3ad   : > { %v1558_v16 = vpop.eup %1557 }
 0x3ae   : > { %v819_v49 = vpop.xlane.xlu0 %818  ;;  %v1560_v62 = vpop.eup %1559 }
 0x3af   : > { %1565 = vrcp.f32 %v819_v49  ;;  %v1562_v21 = vpop.eup %1561 }
 0x3b0   : > { %1567 = vrcp.f32 %v813_v50  ;;  %v1564_v25 = vpop.eup %1563 }
 0x3b9   : > { %v1566_v27 = vpop.eup %1565 }
 0x3ba   : > { %v1568_v29 = vpop.eup %1567 }
 0x3d1   : > { %v1433_v38 = vpop.f32.mrb[24].mxu0 }
 0x3d2   : > { %v886_v42 = vpop.f32.mrb[25].mxu0  ;;  %v1024_v46 = vmul.f32 %v1540_v41, %v1433_v38 }
 0x3d3   : > { %v1434_v45 = vpop.f32.mrb[26].mxu0  ;;  %v1022_v52 = vmul.f32 %v1544_v44, %v886_v42 }
 0x3d4   : > { %v1025_v47 = vmul.f32 %v1542_v43, %v1434_v45  ;;  %v889_v51 = vpop.f32.mrb[27].mxu0 }
 0x3d5   : > { %v1023_v53 = vmul.f32 %v1538_v37, %v889_v51  ;;  %v1306_v37 = vld [vmem:[%s1906_s5] ss:$0 sm:$0xff] }
 0x3d6   : > { %v1039_v55 = vpack.c.bf16 %v1025_v47, %v1024_v46 }
 0x3d7   : > { %v1038_v57 = vpack.c.bf16 %v1023_v53, %v1022_v52 }
 0x3d9   : > { %1459 = vmatprep.mubr.msk.bf16.mxu1 %vm335_vm0, %v1038_v57 }
 0x3da   : > { %v1437_v54 = vpop.f32.mrb[28].mxu0  ;;  %1460 = vmatmul.mubr.msk.bf16.vlgmr.msra.gmra.mrb[8].mxu1 %vm335_vm0, %v1039_v55 }
 0x3db   : > { %v902_v61 = vpop.f32.mrb[29].mxu0  ;;  %v1028_v2 = vmul.f32 %v1548_v59, %v1437_v54 }
 0x3dc   : > { %v1438_v63 = vpop.f32.mrb[30].mxu0  ;;  %v1026_v4 = vmul.f32 %v1546_v58, %v902_v61 }
 0x3dd   : > { %v1029_v3 = vmul.f32 %v1550_v48, %v1438_v63  ;;  %v905_v56 = vpop.f32.mrb[31].mxu0 }
 0x3de   : > { %v1027_v5 = vmul.f32 %v1552_v1, %v905_v56 }
 0x3df   : > { %v1041_v7 = vpack.c.bf16 %v1029_v3, %v1028_v2 }
 0x3e0   : > { %v1040_v60 = vpack.c.bf16 %v1027_v5, %v1026_v4 }
 0x3e2   : > { %1463 = vmatprep.mubr.msk.bf16.mxu1 %vm335_vm0, %v1040_v60 }
 0x3e3   : > { %1464 = vmatmul.mubr.msk.bf16.gmra.mrb[12].mxu1 %vm335_vm0, %v1041_v7 }
 0x3f5   : > { %v1449_v13 = vpop.f32.mrb[32].mxu0 }
 0x3f6   : > { %v975_v15 = vpop.f32.mrb[33].mxu0  ;;  %v1032_v0 = vmul.f32 %v1556_v10, %v1449_v13 }
 0x3f7   : > { %v1450_v17 = vpop.f32.mrb[34].mxu0  ;;  %v1030_v19 = vmul.f32 %v1554_v40, %v975_v15 }
 0x3f8   : > { %v1033_v14 = vmul.f32 %v1558_v16, %v1450_v17  ;;  %v978_v18 = vpop.f32.mrb[35].mxu0 }
 0x3f9   : > { %v1031_v20 = vmul.f32 %v1560_v62, %v978_v18 }
 0x3fa   : > { %v1043_v22 = vpack.c.bf16 %v1033_v14, %v1032_v0 }
 0x3fb   : > { %v1042_v23 = vpack.c.bf16 %v1031_v20, %v1030_v19 }
 0x3fd   : > { %v1453_v24 = vpop.f32.mrb[36].mxu0  ;;  %1467 = vmatprep.mubr.msk.bf16.mxu1 %vm335_vm0, %v1042_v23 }
 0x3fe   : > { %v991_v26 = vpop.f32.mrb[37].mxu0  ;;  %1468 = vmatmul.mubr.msk.bf16.gmra.mrb[16].mxu1 %vm335_vm0, %v1043_v22  ;;  %v1036_v30 = vmul.f32 %v1564_v25, %v1453_v24 }
 0x3ff   : > { %v1454_v28 = vpop.f32.mrb[38].mxu0  ;;  %v1034_v33 = vmul.f32 %v1562_v21, %v991_v26 }
 0x400   : > { %v1037_v31 = vmul.f32 %v1566_v27, %v1454_v28  ;;  %v994_v32 = vpop.f32.mrb[39].mxu0 }
 0x401   : > { %v1035_v34 = vmul.f32 %v1568_v29, %v994_v32 }
 0x402   : > { %v1045_v35 = vpack.c.bf16 %v1037_v31, %v1036_v30 }
 0x403   : > { %v1044_v36 = vpack.c.bf16 %v1035_v34, %v1034_v33 }
 0x405   : > { %1471 = vmatprep.mubr.msk.bf16.mxu1 %vm335_vm0, %v1044_v36 }
 0x406   : > { %1472 = vmatmul.mubr.msk.bf16.gmra.mrb[20].mxu1 %vm335_vm0, %v1045_v35 }
 0x4ad   : > { %v1461_v38 = vpop.f32.mrb[8].mxu1 }
 0x4ae   : > { %v1136_v41 = vadd.f32 %v1461_v38, %v1306_v37  ;;  %v1127_v42 = vpop.f32.mrb[9].mxu1 }
 0x4af   : > { %v1128_v43 = vadd.f32 %v1306_v37, %v1127_v42  ;;  %v1462_v45 = vpop.f32.mrb[10].mxu1 }
 0x4b0   : > { %1192 = vst.msk [vmem:[%s1864_s15 + $0x10] sm:$0xff] %vm335_vm0, %v1136_v41  ;;  %v1139_v44 = vadd.f32 %v1462_v45, %v1306_v37  ;;  %v1130_v46 = vpop.f32.mrb[11].mxu1 }
 0x4b1   : > { %1190 = vst.msk [vmem:[%s1864_s15] sm:$0xff] %vm335_vm0, %v1128_v43  ;;  %v1131_v47 = vadd.f32 %v1306_v37, %v1130_v46 }
 0x4b2   : > { %1193 = vst.msk [vmem:[%s1864_s15 + $0x18] sm:$0xff] %vm335_vm0, %v1139_v44 }
 0x4b3   : > { %1191 = vst.msk [vmem:[%s1864_s15 + $0x8] sm:$0xff] %vm335_vm0, %v1131_v47 }
 0x4b6   : > { %v1465_v51 = vpop.f32.mrb[12].mxu1 }
 0x4b7   : > { %v1152_v52 = vadd.f32 %v1465_v51, %v1306_v37  ;;  %v1143_v53 = vpop.f32.mrb[13].mxu1 }
 0x4b8   : > { %v1144_v55 = vadd.f32 %v1306_v37, %v1143_v53  ;;  %v1466_v57 = vpop.f32.mrb[14].mxu1 }
 0x4b9   : > { %1196 = vst.msk [vmem:[%s1864_s15 + $0x30] sm:$0xff] %vm335_vm0, %v1152_v52  ;;  %v1155_v58 = vadd.f32 %v1466_v57, %v1306_v37  ;;  %v1146_v54 = vpop.f32.mrb[15].mxu1 }
 0x4ba   : > { %1194 = vst.msk [vmem:[%s1864_s15 + $0x20] sm:$0xff] %vm335_vm0, %v1144_v55  ;;  %v1147_v59 = vadd.f32 %v1306_v37, %v1146_v54 }
 0x4bb   : > { %1197 = vst.msk [vmem:[%s1864_s15 + $0x38] sm:$0xff] %vm335_vm0, %v1155_v58 }
 0x4bc   : > { %1195 = vst.msk [vmem:[%s1864_s15 + $0x28] sm:$0xff] %vm335_vm0, %v1147_v59 }
 0x4d1   : > { %v1469_v61 = vpop.f32.mrb[16].mxu1 }
 0x4d2   : > { %v1168_v48 = vadd.f32 %v1469_v61, %v1306_v37  ;;  %v1159_v63 = vpop.f32.mrb[17].mxu1 }
 0x4d3   : > { %v1160_v1 = vadd.f32 %v1306_v37, %v1159_v63  ;;  %v1470_v2 = vpop.f32.mrb[18].mxu1 }
 0x4d4   : > { %1200 = vst.msk [vmem:[%s1864_s15 + $0x50] sm:$0xff] %vm335_vm0, %v1168_v48  ;;  %v1171_v3 = vadd.f32 %v1470_v2, %v1306_v37  ;;  %v1162_v56 = vpop.f32.mrb[19].mxu1 }
 0x4d5   : > { %1198 = vst.msk [vmem:[%s1864_s15 + $0x40] sm:$0xff] %vm335_vm0, %v1160_v1  ;;  %v1163_v4 = vadd.f32 %v1306_v37, %v1162_v56 }
 0x4d6   : > { %1201 = vst.msk [vmem:[%s1864_s15 + $0x58] sm:$0xff] %vm335_vm0, %v1171_v3 }
 0x4d7   : > { %1199 = vst.msk [vmem:[%s1864_s15 + $0x48] sm:$0xff] %vm335_vm0, %v1163_v4 }
 0x4d9   : > { %v1473_v5 = vpop.f32.mrb[20].mxu1 }
 0x4da   : > { %v1184_v6 = vadd.f32 %v1473_v5, %v1306_v37  ;;  %v1175_v7 = vpop.f32.mrb[21].mxu1 }
 0x4db   : > { %v1176_v60 = vadd.f32 %v1306_v37, %v1175_v7  ;;  %v1474_v8 = vpop.f32.mrb[22].mxu1 }
 0x4dc   : > { %1204 = vst.msk [vmem:[%s1864_s15 + $0x70] sm:$0xff] %vm335_vm0, %v1184_v6  ;;  %v1187_v9 = vadd.f32 %v1474_v8, %v1306_v37  ;;  %v1178_v39 = vpop.f32.mrb[23].mxu1 }
 0x4dd   : > { %1202 = vst.msk [vmem:[%s1864_s15 + $0x60] sm:$0xff] %vm335_vm0, %v1176_v60  ;;  %v1179_v11 = vadd.f32 %v1306_v37, %v1178_v39 }
 0x4de   : > { %1205 = vst.msk [vmem:[%s1864_s15 + $0x78] sm:$0xff] %vm335_vm0, %v1187_v9 }
 0x4df   : > { %1203 = vst.msk [vmem:[%s1864_s15 + $0x68] sm:$0xff] %vm335_vm0, %v1179_v11 }
 0x4e0 PF: > { %s16_s21 = sadd.s32 1, %s1575_s21  }
 0x4e1   : > { %p13_p4 = scmp.ge.s32.totalorder %s16_s21, 6  }
 0x4e3   :  { %15 = sbr.rel (!%p13_p4) target bundleno = 1 (0x1), region = 74 }

</bundles_post_ra>
